<compile_context>
chip_gen: v7x
topology: tpu7x:2x2x1
jax: 0.10.0
libtpu: 0.0.40
codegen_flags: <defaults>
</compile_context>

<pallas_src>
import math

import jax
import jax.numpy as jnp
from jax.experimental import pallas as pl
from jax.experimental.pallas import tpu as pltpu


def _round_up(x, m):
    return ((x + m - 1) // m) * m


def _round_down(x, m):
    return (x // m) * m


def _pick_tile(dim_aligned, align, target):
    """Largest tile <= target (multiple of `align`); prefer a divisor of
    dim_aligned (=> no padding) as long as it is not much smaller than target."""
    if dim_aligned <= target:
        return dim_aligned
    target = max(align, _round_down(target, align))
    t = target
    while t >= align:
        if dim_aligned % t == 0:
            if t * 4 >= target:   # accept divisor unless it is << target
                return t
            break
        t -= align
    return target


def _vmem_budget():
    """(vmem_limit_bytes, tile_footprint_budget) with per-generation headroom."""
    try:
        cap = int(pltpu.get_tpu_info().vmem_capacity_bytes)
    except Exception:
        cap = 64 * 1024 * 1024  # conservative fallback: v7x per-TC VMEM
    # ~48 MiB on v7x (64 MiB physical), ~108 MiB on v5e/v6e (128 MiB physical).
    vmem_limit = max(32 * 1024 * 1024,
                     min(cap - 16 * 1024 * 1024, int(cap * 0.85), 112 * 1024 * 1024))
    return int(vmem_limit), int(vmem_limit * 0.85)


def _linear_kernel_bias(x_ref, w_ref, b_ref, o_ref):
    # x_ref: (tm, tk); w_ref: (tk, tn) pre-transposed weight; b_ref: (1, tn);
    # o_ref: (tm, tn) fp32, resident across the K grid axis (acts as accumulator).
    part = jnp.dot(x_ref[...], w_ref[...], preferred_element_type=jnp.float32)
    k = pl.program_id(2)

    @pl.when(k == 0)
    def _():
        o_ref[...] = part + b_ref[...]

    @pl.when(k > 0)
    def _():
        o_ref[...] += part


def _linear_kernel_nobias(x_ref, w_ref, o_ref):
    part = jnp.dot(x_ref[...], w_ref[...], preferred_element_type=jnp.float32)
    k = pl.program_id(2)

    @pl.when(k == 0)
    def _():
        o_ref[...] = part

    @pl.when(k > 0)
    def _():
        o_ref[...] += part


def unoptimized_linear(x, weight, bias=None, *, tm=None, tn=None, tk=None,
                       compute_dtype=jnp.float32, weight_is_transposed=False,
                       weight_buffers=None):
    """out = x @ weight.T + bias via a tiled Pallas TPU kernel.

    x:      (B, in_features)
    weight: (out_features, in_features) PyTorch layout, or (in_features, out_features)
            when weight_is_transposed=True (preferred: store it transposed once).
    bias:   (out_features,) or None
    compute_dtype: jnp.float32 (exact, default) or jnp.bfloat16 (faster MXU /
            half the HBM traffic, fp32 accumulation; caller's precision trade-off).
    weight_buffers: optional pipeline depth for the weight stream (e.g. 3 for the
            small-batch GEMV regime); default double-buffering.
    """
    out_dtype = jnp.float32
    if weight_is_transposed:
        w_t = weight
        K, N = w_t.shape
    else:
        N, K = weight.shape
        w_t = weight.T  # one-time (K, N) layout; amortized over all M-tile reuse
    B, K2 = x.shape
    assert K == K2, "in_features mismatch"

    x = x.astype(compute_dtype)
    w_t = w_t.astype(compute_dtype)
    in_sz = jnp.dtype(compute_dtype).itemsize

    vmem_limit, tile_budget = _vmem_budget()

    Ma = _round_up(B, 8)
    Na = _round_up(N, 128)
    Ka = _round_up(K, 128)

    w_bufs = 2 if weight_buffers is None else max(2, int(weight_buffers))

    if tm is None:
        # GEMV regime keeps all rows in one tile; otherwise MXU-friendly 256.
        tm = Ma if B <= 8 else _pick_tile(Ma, 8, 256)
    if tn is None:
        tn = _pick_tile(Na, 128, 512)
        # If the M grid collapses to a single tile, keep >= 2 N tiles so both
        # v7x TensorCores get parallel work.
        if Ma == tm and Na // tn < 2 and Na >= 256:
            tn = _pick_tile(Na, 128, _round_down(Na // 2, 128))
    if tk is None:
        denom = (2 * tm + w_bufs * tn) * in_sz
        avail = max(tile_budget - w_bufs * tn * in_sz - 2 * tm * tn * 4, 0)
        tk_cap = min(2048, max(128, _round_down(avail // denom, 128)))
        tk = _pick_tile(Ka, 128, tk_cap)

    Mp = _round_up(B, tm)
    Np = _round_up(N, tn)
    Kp = _round_up(K, tk)

    # Zero-pad only when ragged (zeros are a no-op for the matmul reduction).
    if (Mp, Kp) != (B, K):
        x = jnp.pad(x, ((0, Mp - B), (0, Kp - K)))
    if (Kp, Np) != (K, N):
        w_t = jnp.pad(w_t, ((0, Kp - K), (0, Np - N)))

    have_bias = bias is not None
    if have_bias:
        bias2d = bias.astype(jnp.float32).reshape(1, N)
        if Np != N:
            bias2d = jnp.pad(bias2d, ((0, 0), (0, Np - N)))

    grid_m, grid_n, grid_k = Mp // tm, Np // tn, Kp // tk

    x_spec = pl.BlockSpec((tm, tk), lambda i, j, k: (i, k))
    w_spec = pl.BlockSpec((tk, tn), lambda i, j, k: (k, j))
    if weight_buffers is not None:
        try:  # deeper weight-stream buffering (GEMV / latency-exposed regime)
            w_spec = pl.BlockSpec((tk, tn), lambda i, j, k: (k, j),
                                  pipeline_mode=pl.Buffered(w_bufs))
        except TypeError:
            pass  # older API without pipeline_mode; keep default double-buffering

    in_specs = [x_spec, w_spec]
    args = [x, w_t]
    if have_bias:
        in_specs.append(pl.BlockSpec((1, tn), lambda i, j, k: (0, j)))
        args.append(bias2d)
        kernel = _linear_kernel_bias
    else:
        kernel = _linear_kernel_nobias

    cost = pl.CostEstimate(
        flops=2 * Mp * Np * Kp,
        transcendentals=0,
        bytes_accessed=(Mp * Kp * in_sz * grid_n       # x re-streamed per N tile
                        + Kp * Np * in_sz * grid_m     # W re-streamed per M tile
                        + Mp * Np * 4                  # output write
                        + (Np * 4 * grid_m if have_bias else 0)),
    )

    out = pl.pallas_call(
        kernel,
        out_shape=jax.ShapeDtypeStruct((Mp, Np), out_dtype),
        grid_spec=pltpu.PrefetchScalarGridSpec(
            num_scalar_prefetch=0,
            grid=(grid_m, grid_n, grid_k),
            in_specs=in_specs,
            out_specs=pl.BlockSpec((tm, tn), lambda i, j, k: (i, j)),
        ),
        compiler_params=pltpu.CompilerParams(
            dimension_semantics=("parallel", "parallel", "arbitrary"),
            vmem_limit_bytes=int(vmem_limit),
        ),
        cost_estimate=cost,
    )(*args)

    if (Mp, Np) != (B, N):
        out = out[:B, :N]
    return out


def init_params(key, in_features, out_features, use_bias=True):
    """Deterministic init mimicking reset_parameters():
    kaiming_uniform_(a=sqrt(5)) for weight, uniform(-1/sqrt(fan_in), ...) for bias."""
    kw, kb = jax.random.split(key)
    fan_in = in_features
    gain = math.sqrt(2.0 / (1.0 + 5.0))  # calculate_gain('leaky_relu', sqrt(5))
    w_bound = gain * math.sqrt(3.0 / fan_in)
    weight = jax.random.uniform(
        kw, (out_features, in_features), jnp.float32, minval=-w_bound, maxval=w_bound
    )
    bias = None
    if use_bias:
        b_bound = 1.0 / math.sqrt(fan_in)
        bias = jax.random.uniform(
            kb, (out_features,), jnp.float32, minval=-b_bound, maxval=b_bound
        )
    return weight, bias


if __name__ == "__main__":
    key = jax.random.PRNGKey(0)
    k_x, k_p = jax.random.split(key)

    batch = 2
    in_features = 32
    out_features = 16

    x = jax.random.normal(k_x, (batch, in_features), dtype=jnp.float32)
    weight, bias = init_params(k_p, in_features, out_features, use_bias=True)

    # With bias.
    out = jax.block_until_ready(unoptimized_linear(x, weight, bias))
    ref = x @ weight.T + bias
    assert out.shape == (batch, out_features)
    assert jnp.allclose(out, ref, atol=1e-5, rtol=1e-5), "mismatch vs reference (bias)"

    # Without bias (no zeros bias materialized / DMA'd).
    out_nb = jax.block_until_ready(unoptimized_linear(x, weight, None))
    ref_nb = x @ weight.T
    assert jnp.allclose(out_nb, ref_nb, atol=1e-5, rtol=1e-5), "mismatch (no bias)"

    # Larger tile-aligned shape: exercises the auto-tiled path (single big K tile).
    kb_x, kb_p = jax.random.split(jax.random.PRNGKey(1))
    Bb, Kb, Nb = 256, 1024, 512
    xb = jax.random.normal(kb_x, (Bb, Kb), dtype=jnp.float32)
    wb, bb = init_params(kb_p, Kb, Nb, use_bias=True)
    outb = jax.block_until_ready(unoptimized_linear(xb, wb, bb))
    refb = xb @ wb.T + bb
    assert jnp.allclose(outb, refb, atol=1e-3, rtol=1e-4), "mismatch (large, auto tiles)"

    # Explicit small tiles to exercise the multi-step K accumulation path.
    outk = jax.block_until_ready(
        unoptimized_linear(xb, wb, bb, tm=128, tn=128, tk=256))
    assert jnp.allclose(outk, refb, atol=1e-3, rtol=1e-4), "mismatch (grid_k > 1)"

    # Opt-in bf16 compute path (fp32 accumulation) — looser tolerance.
    outh = jax.block_until_ready(
        unoptimized_linear(x, weight, bias, compute_dtype=jnp.bfloat16))
    assert jnp.allclose(outh, ref, atol=1e-1, rtol=5e-2), "mismatch (bf16 path)"

    print("KERNEL_OK")
</pallas_src>

<mosaic_0001>
module attributes {stable_mosaic.version = 11 : i64} {
  func.func @_linear_kernel_bias(%arg0: i32, %arg1: i32, %arg2: i32, %arg3: memref<8x128xf32, #tpu.memory_space<vmem>>, %arg4: memref<128x128xf32, #tpu.memory_space<vmem>>, %arg5: memref<1x128xf32, #tpu.memory_space<vmem>>, %arg6: memref<8x128xf32, #tpu.memory_space<vmem>>) attributes {dimension_semantics = [#tpu.dimension_semantics<parallel>, #tpu.dimension_semantics<parallel>, #tpu.dimension_semantics<arbitrary>], iteration_bounds = array<i64: 1, 1, 1>, scalar_prefetch = 0 : i64, scratch_operands = 0 : i64, tpu.core_type = #tpu.core_type<tc>, window_params = [{transform_indices = @transform_0, window_bounds = array<i64: 8, 128>}, {transform_indices = @transform_1, window_bounds = array<i64: 128, 128>}, {transform_indices = @transform_2, window_bounds = array<i64: 1, 128>}, {transform_indices = @transform_3, window_bounds = array<i64: 8, 128>}]} {
    %c0 = arith.constant 0 : index
    %c0_0 = arith.constant 0 : index
    %0 = vector.load %arg3[%c0, %c0_0] : memref<8x128xf32, #tpu.memory_space<vmem>>, vector<8x128xf32>
    %c0_1 = arith.constant 0 : index
    %c0_2 = arith.constant 0 : index
    %1 = vector.load %arg4[%c0_1, %c0_2] : memref<128x128xf32, #tpu.memory_space<vmem>>, vector<128x128xf32>
    %cst = arith.constant dense<0.000000e+00> : vector<8x128xf32>
    %2 = tpu.matmul %0, %1, %cst {dimension_numbers = #tpu.dot_dimension_numbers<[1], [0], [0], [1], [0, 0, 1, 1], [], []>} : vector<8x128xf32>, vector<128x128xf32>, vector<8x128xf32> -> vector<8x128xf32>
    %c0_i32 = arith.constant 0 : i32
    %3 = arith.cmpi eq, %arg2, %c0_i32 : i32
    %4 = arith.extui %3 : i1 to i32
    %c0_i32_3 = arith.constant 0 : i32
    %5 = arith.cmpi ne, %4, %c0_i32_3 : i32
    scf.if %5 {
      %c0_6 = arith.constant 0 : index
      %c0_7 = arith.constant 0 : index
      %9 = vector.load %arg5[%c0_6, %c0_7] : memref<1x128xf32, #tpu.memory_space<vmem>>, vector<1x128xf32>
      %10 = vector.broadcast %9 : vector<1x128xf32> to vector<8x128xf32>
      %11 = arith.addf %2, %10 : vector<8x128xf32>
      %c0_8 = arith.constant 0 : index
      %c0_9 = arith.constant 0 : index
      %12 = vector.load %arg6[%c0_8, %c0_9] : memref<8x128xf32, #tpu.memory_space<vmem>>, vector<8x128xf32>
      tpu.vector_store %arg6[%c0_8, %c0_9], %11 {strides = array<i32>} : memref<8x128xf32, #tpu.memory_space<vmem>>, vector<8x128xf32>,
    } else {
    }
    %c0_i32_4 = arith.constant 0 : i32
    %6 = arith.cmpi sgt, %arg2, %c0_i32_4 : i32
    %7 = arith.extui %6 : i1 to i32
    %c0_i32_5 = arith.constant 0 : i32
    %8 = arith.cmpi ne, %7, %c0_i32_5 : i32
    scf.if %8 {
      %c0_6 = arith.constant 0 : index
      %c0_7 = arith.constant 0 : index
      %9 = vector.load %arg6[%c0_6, %c0_7] : memref<8x128xf32, #tpu.memory_space<vmem>>, vector<8x128xf32>
      %10 = arith.addf %9, %2 : vector<8x128xf32>
      %c0_8 = arith.constant 0 : index
      %c0_9 = arith.constant 0 : index
      %11 = vector.load %arg6[%c0_8, %c0_9] : memref<8x128xf32, #tpu.memory_space<vmem>>, vector<8x128xf32>
      tpu.vector_store %arg6[%c0_8, %c0_9], %10 {strides = array<i32>} : memref<8x128xf32, #tpu.memory_space<vmem>>, vector<8x128xf32>,
    } else {
    }
    return
  }
  func.func @transform_0(%arg0: i32, %arg1: i32, %arg2: i32) -> (i32, i32) {
    %c0_i32 = arith.constant 0 : i32
    return %arg0, %arg2 : i32, i32
  }
  func.func @transform_1(%arg0: i32, %arg1: i32, %arg2: i32) -> (i32, i32) {
    %c0_i32 = arith.constant 0 : i32
    return %arg2, %arg1 : i32, i32
  }
  func.func @transform_2(%arg0: i32, %arg1: i32, %arg2: i32) -> (i32, i32) {
    %c0_i32 = arith.constant 0 : i32
    %c0_i32_0 = arith.constant 0 : i32
    return %c0_i32, %arg1 : i32, i32
  }
  func.func @transform_3(%arg0: i32, %arg1: i32, %arg2: i32) -> (i32, i32) {
    %c0_i32 = arith.constant 0 : i32
    return %arg0, %arg1 : i32, i32
  }
}

</mosaic_0001>

<bundles_post_ra>
// kernel: tpu_custom_call.1
= control target key start
LH: loop header
LB: loop body
LE: loop exit
PB: predicated region body
PF: predicated region fallthrough
CT: control target
= control target key end

     0   :  { %8 = vsyncpa [#allocation3], 0  ;;  %s395_s0 = inlined_call_operand.hbm [shape: f32[8,128], index: 0, kind: input, shape index: {}]   ;;  %s396_s1 = inlined_call_operand.hbm [shape: f32[128,128], index: 1, kind: input, shape index: {}]   ;;  %s397_s2 = inlined_call_operand.vmem [shape: f32[1,128], index: 2, kind: input, shape index: {}]   ;;  %s398_s3 = inlined_call_operand.hbm [shape: f32[8,128], index: 3, kind: output, shape index: {}]  }
   0x1   :  { %9 = vsyncpa [#allocation6], 0 }
   0x2   :  { %10 = vsyncpa [#allocation4], 0  ;;  %s321_s12 = smov [#allocation2]   ;;  %s322_s14 = smov [#allocation5]  }
   0x3   :  { %s17_s13 = sshll.u32 %s321_s12, 4  ;;  %s26_s15 = sshll.u32 %s322_s14, 4  ;;  %s18_s13 = int_to_ptr.vmem [resolvable:$true] %s17_s13  ;;  %s349_s15 = int_to_ptr.vmem [resolvable:$true] %s26_s15 }
   0x4   :  { %s249_s18 = scalar_lea.hbm %s395_s0, 128 }
   0x5   :  { %p250_p0 = scmp.ne.s32.totalorder %s395_s0, %s249_s18  ;;  %p253_p1 = scmp.lt.u32.totalorder %s249_s18, %s395_s0 }
   0x7   :  { %p255_p2 = pnand %p253_p1, %p250_p0 }
   0x9   :  { %258 = shalt.err (!%p255_p2)
}
   0xa   :  { %s259_s23 = scalar_lea.vmem %s18_s13, 128  ;;  %p264_p4 = scmp.lt.s32.totalorder %s18_s13, %s18_s13 }
   0xb   :  { %p260_p3 = scmp.ne.s32.totalorder %s18_s13, %s259_s23  ;;  %p265_p5 = scmp.lt.s32.totalorder %s259_s23, %s259_s23 }
   0xd   :  { %p266_p6 = por %p265_p5, %p264_p4 }
   0xf   :  { %p267_p7 = pnand %p266_p6, %p260_p3 }
  0x11   :  { %270 = shalt.err (!%p267_p7)
}
  0x12   :  { %20 = dma.hbm_to_vmem [thread:$0]  %s395_s0, 128, %s18_s13, [#allocation3]  }
  0x13   :  { %s271_s28 = scalar_lea.hbm %s396_s1, 2048 }
  0x14   :  { %p272_p8 = scmp.ne.s32.totalorder %s396_s1, %s271_s28  ;;  %p275_p9 = scmp.lt.u32.totalorder %s271_s28, %s396_s1 }
  0x16   :  { %p277_p10 = pnand %p275_p9, %p272_p8 }
  0x18   :  { %280 = shalt.err (!%p277_p10)
}
  0x19   :  { %s281_s6 = scalar_lea.vmem %s349_s15, 2048  ;;  %p286_p12 = scmp.lt.s32.totalorder %s349_s15, %s349_s15 }
  0x1a   :  { %p282_p11 = scmp.ne.s32.totalorder %s349_s15, %s281_s6  ;;  %p287_p13 = scmp.lt.s32.totalorder %s281_s6, %s281_s6 }
  0x1c   :  { %p288_p0 = por %p287_p13, %p286_p12 }
  0x1e   :  { %p289_p1 = pnand %p288_p0, %p282_p11 }
  0x20   :  { %292 = shalt.err (!%p289_p1)
}
  0x21   :  { %s323_s0 = smov 128   ;;  %s324_s7 = smov 8  }
  0x22   :  { %32 = dma.hbm_to_vmem [thread:$0]  %s396_s1, 2048, %s349_s15, [#allocation6], %s323_s0, %s323_s0, %s324_s7  }
  0x23   :  { %315 = dma.done.wait [#allocation3], 128  }
  0x24   :  { %316 = vsyncadd [#allocation3], 4294967168 }
  0x25   :  { %317 = dma.done.wait [#allocation6], 2048  }
  0x26   :  { %318 = vsyncadd [#allocation6], 4294965248  ;;  %v325_v0 = vmov 0.0|0.0   ;;  %vm326_vm0 = vmmov 0   ;;  %v327_v1 = vmov 0.0   ;;  %v42_v2 = vld [vmem:[#allocation5] sm:$0xff] }
  0x27   :  { %217 = vmatprep.subr.bf16.mxu0 %v325_v0  ;;  %214 = vmatprep.mubr.msk.f32.mxu0 %vm326_vm0, %v327_v1  ;;  %v43_v3 = vld [vmem:[#allocation5 + $0x8] sm:$0xff]  ;;  %v44_v4 = vld [vmem:[#allocation5 + $0x10] sm:$0xff]  ;;  %v45_v6 = vld [vmem:[#allocation5 + $0x18] sm:$0xff]  ;;  %s328_s11 = smov [#allocation7]  }
  0x28   :  { %v218_v5 = vpack.c.bf16 %v43_v3, %v42_v2  ;;  %v221_v7 = vpack.c.bf16 %v45_v6, %v44_v4  ;;  %v46_v8 = vld [vmem:[#allocation5 + $0x20] sm:$0xff]  ;;  %v47_v9 = vld [vmem:[#allocation5 + $0x28] sm:$0xff]  ;;  %v48_v11 = vld [vmem:[#allocation5 + $0x30] sm:$0xff]  ;;  %s154_s12 = sshll.u32 %s328_s11, 4  ;;  %s155_s12 = int_to_ptr.vmem [resolvable:$true] %s154_s12 }
  0x29   :  { %v224_v10 = vpack.c.bf16 %v47_v9, %v46_v8  ;;  %v49_v12 = vld [vmem:[#allocation5 + $0x38] sm:$0xff]  ;;  %v50_v14 = vld [vmem:[#allocation5 + $0x40] sm:$0xff]  ;;  %v51_v15 = vld [vmem:[#allocation5 + $0x48] sm:$0xff]  ;;  %s293_s13 = scalar_lea.vmem %s155_s12, 128  ;;  %p298_p3 = scmp.lt.s32.totalorder %s155_s12, %s155_s12 }
  0x2a   :  { %219 = vmatpush3.bf16.msra.mxu0 %v218_v5  ;;  %v227_v13 = vpack.c.bf16 %v49_v12, %v48_v11  ;;  %v230_v16 = vpack.c.bf16 %v51_v15, %v50_v14  ;;  %v52_v17 = vld [vmem:[#allocation5 + $0x50] sm:$0xff]  ;;  %v53_v18 = vld [vmem:[#allocation5 + $0x58] sm:$0xff]  ;;  %v54_v20 = vld [vmem:[#allocation5 + $0x60] sm:$0xff]  ;;  %p294_p2 = scmp.ne.s32.totalorder %s155_s12, %s293_s13  ;;  %p299_p4 = scmp.lt.s32.totalorder %s293_s13, %s293_s13 }
  0x2b   :  { %220 = vmatprep.subr.bf16.mxu0 %v325_v0  ;;  %v233_v19 = vpack.c.bf16 %v53_v18, %v52_v17  ;;  %v55_v21 = vld [vmem:[#allocation5 + $0x68] sm:$0xff]  ;;  %v56_v23 = vld [vmem:[#allocation5 + $0x70] sm:$0xff]  ;;  %v57_v24 = vld [vmem:[#allocation5 + $0x78] sm:$0xff] }
  0x2c   :  { %v236_v22 = vpack.c.bf16 %v55_v21, %v54_v20  ;;  %v239_v25 = vpack.c.bf16 %v57_v24, %v56_v23  ;;  %v41_v26 = vld [vmem:[#allocation2] sm:$0xff]  ;;  %p300_p5 = por %p299_p4, %p298_p3 }
  0x2d   :  { %v164_v27 = vld [vmem:[%s397_s2] ss:$0 sm:$0xff] }
  0x2e   :  { %222 = vmatpush3.bf16.msra.mxu0 %v221_v7  ;;  %p301_p6 = pnand %p300_p5, %p294_p2 }
  0x2f   :  { %223 = vmatprep.subr.bf16.mxu0 %v325_v0 }
  0x32   :  { %225 = vmatpush3.bf16.msra.mxu0 %v224_v10 }
  0x33   :  { %226 = vmatprep.subr.bf16.mxu0 %v325_v0 }
  0x36   :  { %228 = vmatpush3.bf16.msra.mxu0 %v227_v13 }
  0x37   :  { %229 = vmatprep.subr.bf16.mxu0 %v325_v0 }
  0x3a   :  { %231 = vmatpush3.bf16.msra.mxu0 %v230_v16 }
  0x3b   :  { %232 = vmatprep.subr.bf16.mxu0 %v325_v0 }
  0x3e   :  { %234 = vmatpush3.bf16.msra.mxu0 %v233_v19 }
  0x3f   :  { %235 = vmatprep.subr.bf16.mxu0 %v325_v0 }
  0x42   :  { %237 = vmatpush3.bf16.msra.mxu0 %v236_v22 }
  0x43   :  { %238 = vmatprep.subr.bf16.mxu0 %v325_v0 }
  0x46   :  { %240 = vmatpush3.bf16.msra.mxu0 %v239_v25 }
  0x49   :  { %215 = vmatmul.mubr.f32.vlgmr.msra.gmra.mrb[0].mxu0 %v41_v26 }
 0x11c   :  { %v124_v28 = vpop.f32.mrb[0].mxu0 }
 0x11d   :  { %v139_v29 = vadd.f32 %v164_v27, %v124_v28  ;;  %v216_v30 = vpop.f32.mrb[1].mxu0 }
 0x11f   :  { %140 = vst [vmem:[#allocation7] sm:$0xff] %v139_v29 }
 0x120   :  { %304 = shalt.err (!%p301_p6)
}
 0x121   :  { %s305_s16 = scalar_lea.hbm %s398_s3, 128 }
 0x122   :  { %p306_p7 = scmp.ne.s32.totalorder %s398_s3, %s305_s16  ;;  %p309_p8 = scmp.lt.u32.totalorder %s305_s16, %s398_s3 }
 0x124   :  { %p311_p9 = pnand %p309_p8, %p306_p7 }
 0x126   :  { %314 = shalt.err (!%p311_p9)
}
 0x127   :  { %157 = dma.vmem_to_hbm [thread:$0]  %s155_s12, 128, %s398_s3, [#allocation4]  }
 0x128   :  { %319 = dma.done.wait [#allocation4], 128  }
 0x129   :  { %320 = vsyncadd [#allocation4], 4294967168 }
 0x12a   :  { %161 = vsyncpa [#allocation3], 1 }
 0x12b   :  { %162 = vsyncpa [#allocation6], 1 }
 0x12c   :  { %163 = vsyncpa [#allocation4], 1 }

</bundles_post_ra>
